<compile_context>
chip_gen: v7x
topology: tpu7x:2x2x1
jax: 0.10.0
libtpu: 0.0.40
codegen_flags: <defaults>
</compile_context>

<pallas_src>
import math

import jax
import jax.numpy as jnp
from jax.experimental import pallas as pl
from jax.experimental.pallas import tpu as pltpu

HIDDEN = 10
OUT = 6
OUT_PAD = 8                 # pad output rows to a full sublane group (unmasked vst)
DEFAULT_TILE_N = 16384      # lane tile (batch samples per grid step); sweepable.


def _cdiv(a, b):
    return -(-a // b)


def _round_up(x, m):
    return _cdiv(x, m) * m


def _choose_tiling(n, tile_n):
    """Adaptive lane tiling.

    Pads N only up to a multiple of 128, then picks the smallest number of
    grid steps whose tile fits `tile_n`, rounding the tile to 128 lanes.
    For mid/large N the step count is forced even so a 'parallel' grid splits
    evenly across v7x's 2 TensorCores.
    """
    n128 = _round_up(max(int(n), 1), 128)
    n_steps = _cdiv(n128, int(tile_n))
    if n_steps % 2 == 1 and n128 >= 1024:   # enough work to split across 2 TCs
        n_steps += 1
    tile = _round_up(_cdiv(n128, n_steps), 128)
    n_pad = tile * n_steps
    return tile, n_pad, n_steps


def _parameter_net_kernel(t_ref, w1_ref, b1_ref, w2_ref, b2_ref, w3_ref, b3_ref,
                          out_ref):
    # t_ref: (1, TN) batch-on-lanes; weights are PyTorch (out, in), biases (out, 1).
    t = t_ref[...]                                   # (1, TN)

    # Layer 1: in_features == 1 -> pure broadcast multiply + tanh (VPU + EUP).
    h1 = jnp.tanh(w1_ref[...] * t + b1_ref[...])     # (H, TN)

    # Layer 2: W2 @ h1 + b2 on the MXU (f32 accumulation).
    acc2 = jnp.dot(w2_ref[...], h1, preferred_element_type=jnp.float32) + b2_ref[...]
    h2 = jnp.tanh(acc2)                              # (H, TN)

    # Output layer (rows padded to 8): W3 @ h2 + b3 on the MXU.
    acc3 = jnp.dot(w3_ref[...], h2, preferred_element_type=jnp.float32) + b3_ref[...]

    # sigmoid(x) == 0.5 * tanh(0.5 * x) + 0.5 -> single EUP op per vreg.
    out_ref[...] = 0.5 * jnp.tanh(0.5 * acc3) + 0.5  # lane-dense (OUT_PAD, TN) store


def parameter_net_forward(t, params, tile_n=DEFAULT_TILE_N):
    """t: (N, 1) float32.  Returns (beta, gamma_c, delta_c, eta, mu, omega), each (N,)."""
    w1, b1, w2, b2, w3, b3 = params
    n = t.shape[0]

    # Batch on lanes: present t as a (1, N) row; pad N adaptively (multiple of 128).
    tile, n_pad, _ = _choose_tiling(n, tile_n)
    t_row = t.reshape(1, n).astype(jnp.float32)
    if n_pad != n:
        t_row = jnp.pad(t_row, ((0, 0), (0, n_pad - n)))
    grid = (n_pad // tile,)

    # Zero-pad the output layer from 6 to 8 rows (padded rows sliced off below).
    w3_p = jnp.pad(w3.astype(jnp.float32), ((0, OUT_PAD - OUT), (0, 0)))
    b3_p = jnp.pad(b3.astype(jnp.float32), ((0, OUT_PAD - OUT), (0, 0)))

    cost = pl.CostEstimate(
        flops=400 * n_pad,            # ~2*(10 + 100 + 80) + glue, per sample
        transcendentals=28 * n_pad,   # 2*H tanh + OUT_PAD sigmoid-tanh per sample
        bytes_accessed=36 * n_pad,    # 4B in + 32B out per sample
    )

    out = pl.pallas_call(
        _parameter_net_kernel,
        out_shape=jax.ShapeDtypeStruct((OUT_PAD, n_pad), jnp.float32),
        grid_spec=pltpu.PrefetchScalarGridSpec(
            num_scalar_prefetch=0,
            grid=grid,
            in_specs=[
                pl.BlockSpec((1, tile), lambda i: (0, i)),            # t tile
                pl.BlockSpec((HIDDEN, 1), lambda i: (0, 0)),          # W1 (H,1)
                pl.BlockSpec((HIDDEN, 1), lambda i: (0, 0)),          # b1
                pl.BlockSpec((HIDDEN, HIDDEN), lambda i: (0, 0)),     # W2 (H,H)
                pl.BlockSpec((HIDDEN, 1), lambda i: (0, 0)),          # b2
                pl.BlockSpec((OUT_PAD, HIDDEN), lambda i: (0, 0)),    # W3 (8,H) padded
                pl.BlockSpec((OUT_PAD, 1), lambda i: (0, 0)),         # b3 (8,1) padded
            ],
            out_specs=pl.BlockSpec((OUT_PAD, tile), lambda i: (0, i)),  # (8, TN)
        ),
        compiler_params=pltpu.CompilerParams(
            dimension_semantics=("parallel",)),
        cost_estimate=cost,
    )(t_row, w1, b1, w2, b2, w3_p, b3_p)

    out = out[:OUT, :n]                               # drop row + lane padding
    beta, gamma_c, delta_c, eta, mu, omega = (out[j] for j in range(OUT))
    return beta, gamma_c, delta_c, eta, mu, omega


def init_params(key):
    """Deterministic xavier_normal (tanh gain = 5/3), bias = 0.01.

    Weights kept in the PyTorch (out, in) convention; biases as (out, 1).
    """
    gain = 5.0 / 3.0
    k1, k2, k3 = jax.random.split(key, 3)

    def xavier(k, fan_out, fan_in):
        std = gain * math.sqrt(2.0 / (fan_in + fan_out))
        return std * jax.random.normal(k, (fan_out, fan_in), dtype=jnp.float32)

    w1 = xavier(k1, HIDDEN, 1)                        # (H, 1)
    b1 = jnp.full((HIDDEN, 1), 0.01, jnp.float32)
    w2 = xavier(k2, HIDDEN, HIDDEN)                   # (H, H)
    b2 = jnp.full((HIDDEN, 1), 0.01, jnp.float32)
    w3 = xavier(k3, OUT, HIDDEN)                      # (6, H)
    b3 = jnp.full((OUT, 1), 0.01, jnp.float32)
    return (w1, b1, w2, b2, w3, b3)


def get_constants():
    """sigmoid of the scalar learnable constants (plain-JAX glue, no hot path)."""
    rho = jnp.float32(0.8)
    alpha = jnp.float32(1.0 / 5.0)
    ds = jnp.float32(1.0 / 4.0)
    da = jnp.float32(1.0 / 7.0)
    dH = jnp.float32(1.0 / 13.4)
    return tuple(jax.nn.sigmoid(c) for c in (rho, alpha, ds, da, dH))


def _reference_forward(t, params):
    """Pure-JAX reference (PyTorch convention: y = x @ W.T + b)."""
    w1, b1, w2, b2, w3, b3 = params
    h1 = jnp.tanh(t @ w1.T + b1[:, 0])
    h2 = jnp.tanh(h1 @ w2.T + b2[:, 0])
    raw = h2 @ w3.T + b3[:, 0]
    out = jax.nn.sigmoid(raw)
    return tuple(out[:, j] for j in range(OUT))


def _check(n, tkey, params, tile_n=DEFAULT_TILE_N):
    t = jax.random.uniform(tkey, (n, 1), dtype=jnp.float32)
    outs = parameter_net_forward(t, params, tile_n=tile_n)
    outs = jax.block_until_ready(outs)
    refs = _reference_forward(t, params)
    for o, r in zip(outs, refs):
        assert o.shape == (n,)
        assert jnp.max(jnp.abs(o - r)) < 1e-4


if __name__ == "__main__":
    key = jax.random.PRNGKey(0)
    pkey, tkey1, tkey2 = jax.random.split(key, 3)
    params = init_params(pkey)

    # Small batch (non-multiple of 128): single-step grid, lane padding path.
    _check(300, tkey1, params)
    # Larger batch: exercises the even (2-step) adaptive-tile grid path.
    _check(3000, tkey2, params)

    _ = get_constants()
    print("KERNEL_OK")
</pallas_src>

<mosaic_0001>
module attributes {stable_mosaic.version = 11 : i64} {
  func.func @_parameter_net_kernel(%arg0: i32, %arg1: memref<1x384xf32, #tpu.memory_space<vmem>>, %arg2: memref<10x1xf32, #tpu.memory_space<vmem>>, %arg3: memref<10x1xf32, #tpu.memory_space<vmem>>, %arg4: memref<10x10xf32, #tpu.memory_space<vmem>>, %arg5: memref<10x1xf32, #tpu.memory_space<vmem>>, %arg6: memref<8x10xf32, #tpu.memory_space<vmem>>, %arg7: memref<8x1xf32, #tpu.memory_space<vmem>>, %arg8: memref<8x384xf32, #tpu.memory_space<vmem>>) attributes {dimension_semantics = [#tpu.dimension_semantics<parallel>], iteration_bounds = array<i64: 1>, scalar_prefetch = 0 : i64, scratch_operands = 0 : i64, tpu.core_type = #tpu.core_type<tc>, window_params = [{transform_indices = @transform_0, window_bounds = array<i64: 1, 384>}, {pipeline_mode = #tpu.pipeline_mode<synchronous>, transform_indices = @transform_1, window_bounds = array<i64: 10, 1>}, {pipeline_mode = #tpu.pipeline_mode<synchronous>, transform_indices = @transform_2, window_bounds = array<i64: 10, 1>}, {pipeline_mode = #tpu.pipeline_mode<synchronous>, transform_indices = @transform_3, window_bounds = array<i64: 10, 10>}, {pipeline_mode = #tpu.pipeline_mode<synchronous>, transform_indices = @transform_4, window_bounds = array<i64: 10, 1>}, {pipeline_mode = #tpu.pipeline_mode<synchronous>, transform_indices = @transform_5, window_bounds = array<i64: 8, 10>}, {pipeline_mode = #tpu.pipeline_mode<synchronous>, transform_indices = @transform_6, window_bounds = array<i64: 8, 1>}, {transform_indices = @transform_7, window_bounds = array<i64: 8, 384>}]} {
    %c0 = arith.constant 0 : index
    %c0_0 = arith.constant 0 : index
    %0 = vector.load %arg1[%c0, %c0_0] : memref<1x384xf32, #tpu.memory_space<vmem>>, vector<1x384xf32>
    %c0_1 = arith.constant 0 : index
    %c0_2 = arith.constant 0 : index
    %1 = vector.load %arg2[%c0_1, %c0_2] : memref<10x1xf32, #tpu.memory_space<vmem>>, vector<10x1xf32>
    %2 = vector.broadcast %1 : vector<10x1xf32> to vector<10x384xf32>
    %3 = vector.broadcast %0 : vector<1x384xf32> to vector<10x384xf32>
    %4 = arith.mulf %2, %3 : vector<10x384xf32>
    %c0_3 = arith.constant 0 : index
    %c0_4 = arith.constant 0 : index
    %5 = vector.load %arg3[%c0_3, %c0_4] : memref<10x1xf32, #tpu.memory_space<vmem>>, vector<10x1xf32>
    %6 = vector.broadcast %5 : vector<10x1xf32> to vector<10x384xf32>
    %7 = arith.addf %4, %6 : vector<10x384xf32>
    %8 = math.tanh %7 : vector<10x384xf32>
    %c0_5 = arith.constant 0 : index
    %c0_6 = arith.constant 0 : index
    %9 = vector.load %arg4[%c0_5, %c0_6] : memref<10x10xf32, #tpu.memory_space<vmem>>, vector<10x10xf32>
    %cst = arith.constant dense<0.000000e+00> : vector<10x384xf32>
    %10 = tpu.matmul %9, %8, %cst {dimension_numbers = #tpu.dot_dimension_numbers<[1], [0], [0], [1], [0, 0, 1, 1], [], []>} : vector<10x10xf32>, vector<10x384xf32>, vector<10x384xf32> -> vector<10x384xf32>
    %c0_7 = arith.constant 0 : index
    %c0_8 = arith.constant 0 : index
    %11 = vector.load %arg5[%c0_7, %c0_8] : memref<10x1xf32, #tpu.memory_space<vmem>>, vector<10x1xf32>
    %12 = vector.broadcast %11 : vector<10x1xf32> to vector<10x384xf32>
    %13 = arith.addf %10, %12 : vector<10x384xf32>
    %14 = math.tanh %13 : vector<10x384xf32>
    %c0_9 = arith.constant 0 : index
    %c0_10 = arith.constant 0 : index
    %15 = vector.load %arg6[%c0_9, %c0_10] : memref<8x10xf32, #tpu.memory_space<vmem>>, vector<8x10xf32>
    %cst_11 = arith.constant dense<0.000000e+00> : vector<8x384xf32>
    %16 = tpu.matmul %15, %14, %cst_11 {dimension_numbers = #tpu.dot_dimension_numbers<[1], [0], [0], [1], [0, 0, 1, 1], [], []>} : vector<8x10xf32>, vector<10x384xf32>, vector<8x384xf32> -> vector<8x384xf32>
    %c0_12 = arith.constant 0 : index
    %c0_13 = arith.constant 0 : index
    %17 = vector.load %arg7[%c0_12, %c0_13] : memref<8x1xf32, #tpu.memory_space<vmem>>, vector<8x1xf32>
    %18 = vector.broadcast %17 : vector<8x1xf32> to vector<8x384xf32>
    %19 = arith.addf %16, %18 : vector<8x384xf32>
    %cst_14 = arith.constant 5.000000e-01 : f32
    %20 = vector.broadcast %cst_14 : f32 to vector<8x384xf32>
    %21 = arith.mulf %20, %19 : vector<8x384xf32>
    %22 = math.tanh %21 : vector<8x384xf32>
    %cst_15 = arith.constant 5.000000e-01 : f32
    %23 = vector.broadcast %cst_15 : f32 to vector<8x384xf32>
    %24 = arith.mulf %23, %22 : vector<8x384xf32>
    %cst_16 = arith.constant 5.000000e-01 : f32
    %25 = vector.broadcast %cst_16 : f32 to vector<8x384xf32>
    %26 = arith.addf %24, %25 : vector<8x384xf32>
    %c0_17 = arith.constant 0 : index
    %c0_18 = arith.constant 0 : index
    %27 = vector.load %arg8[%c0_17, %c0_18] : memref<8x384xf32, #tpu.memory_space<vmem>>, vector<8x384xf32>
    tpu.vector_store %arg8[%c0_17, %c0_18], %26 {strides = array<i32>} : memref<8x384xf32, #tpu.memory_space<vmem>>, vector<8x384xf32>,
    return
  }
  func.func @transform_0(%arg0: i32) -> (i32, i32) {
    %c0_i32 = arith.constant 0 : i32
    %c0_i32_0 = arith.constant 0 : i32
    return %c0_i32, %arg0 : i32, i32
  }
  func.func @transform_1(%arg0: i32) -> (i32, i32) {
    %c0_i32 = arith.constant 0 : i32
    %c0_i32_0 = arith.constant 0 : i32
    %c0_i32_1 = arith.constant 0 : i32
    return %c0_i32, %c0_i32_0 : i32, i32
  }
  func.func @transform_2(%arg0: i32) -> (i32, i32) {
    %c0_i32 = arith.constant 0 : i32
    %c0_i32_0 = arith.constant 0 : i32
    %c0_i32_1 = arith.constant 0 : i32
    return %c0_i32, %c0_i32_0 : i32, i32
  }
  func.func @transform_3(%arg0: i32) -> (i32, i32) {
    %c0_i32 = arith.constant 0 : i32
    %c0_i32_0 = arith.constant 0 : i32
    %c0_i32_1 = arith.constant 0 : i32
    return %c0_i32, %c0_i32_0 : i32, i32
  }
  func.func @transform_4(%arg0: i32) -> (i32, i32) {
    %c0_i32 = arith.constant 0 : i32
    %c0_i32_0 = arith.constant 0 : i32
    %c0_i32_1 = arith.constant 0 : i32
    return %c0_i32, %c0_i32_0 : i32, i32
  }
  func.func @transform_5(%arg0: i32) -> (i32, i32) {
    %c0_i32 = arith.constant 0 : i32
    %c0_i32_0 = arith.constant 0 : i32
    %c0_i32_1 = arith.constant 0 : i32
    return %c0_i32, %c0_i32_0 : i32, i32
  }
  func.func @transform_6(%arg0: i32) -> (i32, i32) {
    %c0_i32 = arith.constant 0 : i32
    %c0_i32_0 = arith.constant 0 : i32
    %c0_i32_1 = arith.constant 0 : i32
    return %c0_i32, %c0_i32_0 : i32, i32
  }
  func.func @transform_7(%arg0: i32) -> (i32, i32) {
    %c0_i32 = arith.constant 0 : i32
    %c0_i32_0 = arith.constant 0 : i32
    return %c0_i32, %arg0 : i32, i32
  }
}

</mosaic_0001>

<bundles_post_ra>
// kernel: tpu_custom_call.1
= control target key start
LH: loop header
LB: loop body
LE: loop exit
PB: predicated region body
PF: predicated region fallthrough
CT: control target
= control target key end

     0   :  { %v581_v2 = vmov 0   ;;  %s696_s0 = inlined_call_operand.vmem [shape: f32[1,384], index: 0, kind: input, shape index: {}]   ;;  %s697_s1 = inlined_call_operand.vmem [shape: f32[10,1], index: 1, kind: input, shape index: {}]   ;;  %s698_s2 = inlined_call_operand.vmem [shape: f32[10,1], index: 2, kind: input, shape index: {}]   ;;  %s699_s3 = inlined_call_operand.vmem [shape: f32[10,10], index: 3, kind: input, shape index: {}]   ;;  %s700_s4 = inlined_call_operand.vmem [shape: f32[10,1], index: 4, kind: input, shape index: {}]   ;;  %s701_s5 = inlined_call_operand.vmem [shape: f32[8,10], index: 5, kind: input, shape index: {}]   ;;  %s702_s6 = inlined_call_operand.vmem [shape: f32[8,1], index: 6, kind: input, shape index: {}]   ;;  %s703_s7 = inlined_call_operand.hbm [shape: f32[8,384], index: 7, kind: output, shape index: {}]  }
   0x1   :  { %v62_v0 = vld [vmem:[%s698_s2] sm:$0xff]  ;;  %526 = vset.pattern.permute.xlu1 %v581_v2  ;;  %525 = vset.pattern.permute.xlu0 %v581_v2 }
   0x2   :  { %v28_v1 = vld [vmem:[%s697_s1] sm:$0xff]  ;;  %66 = vperm.xlu1 %526, %v62_v0  }
   0x3   :  { %32 = vperm.xlu0 %525, %v28_v1  }
   0x4   :  { %12 = vsyncpa [#allocation3], 0  ;;  %v63_v3 = vld [vmem:[%s698_s2 + $0x8] sm:$0x3]  ;;  %v88_v6 = vld [vmem:[%s700_s4] sm:$0xff]  ;;  %vm100_vm0 = vcmask 80896   ;;  %v41_v10 = vlaneseq }
   0x5   :  { %v29_v4 = vld [vmem:[%s697_s1 + $0x8] sm:$0x3]  ;;  %v276_v7 = vld [vmem:[%s702_s6] sm:$0xff]  ;;  %v582_v9 = vmov 0.0   ;;  %vm107_vm1 = vcmask 1041408   ;;  %vm583_vm2 = vmmov 1  }
   0x6   :  { %71 = vperm.xlu1 %526, %v63_v3   ;;  %v89_v5 = vld [vmem:[%s700_s4 + $0x8] sm:$0x3]  ;;  %v86_v8 = vld [vmem:[%s699_s3] sm:$0xff]  ;;  %181 = vmatprep.mubr.f32.mxu0 %v582_v9  ;;  %v42_v11 = vshrl.u32 %v41_v10, 7  ;;  %vm655_vm3 = vmpackc.low %vm107_vm1, %vm583_vm2  ;;  %v584_v46 = vmov 0.0|0.0   ;;  %vm585_vm4 = vmmov 0  }
   0x7   :  { %37 = vperm.xlu0 %525, %v29_v4   ;;  %487 = vmatprep.mubr.msk.f32.mxu1 %vm100_vm0, %v86_v8  ;;  %v27_v15 = vld [vmem:[%s696_s0] sm:$0x7]  ;;  %v87_v45 = vld [vmem:[%s699_s3 + $0x8] sm:$0x3] }
   0x8   :  { %v43_v12 = vsub.s32 0, %v42_v11  ;;  %v47_v13 = vsub.s32 1, %v42_v11  ;;  %v51_v14 = vsub.s32 2, %v42_v11 }
   0xa   :  { %97 = vperm.xlu1 %526, %v89_v5   ;;  %v44_v16 = vrot.slane %v27_v15, %v43_v12  ;;  %v48_v17 = vrot.slane %v27_v15, %v47_v13  ;;  %v52_v18 = vrot.slane %v27_v15, %v51_v14  ;;  %v275_v5 = vld [vmem:[%s701_s5] sm:$0xff]  ;;  %s586_s5 = smov [#allocation2]  }
   0xb   :  { %92 = vperm.xlu0 %525, %v88_v6   ;;  %s456_s17 = sshll.u32 %s586_s5, 4  ;;  %s457_s17 = int_to_ptr.vmem [resolvable:$true] %s456_s17 }
   0xc   :  { %s557_s18 = scalar_lea.vmem %s457_s17, 384  ;;  %p562_p1 = scmp.lt.s32.totalorder %s457_s17, %s457_s17 }
   0xd   :  { %p558_p0 = scmp.ne.s32.totalorder %s457_s17, %s557_s18  ;;  %p563_p2 = scmp.lt.s32.totalorder %s557_s18, %s557_s18 }
   0xf   :  { %279 = vperm.xlu0 %525, %v276_v7   ;;  %p564_p3 = por %p563_p2, %p562_p1 }
  0x11   :  { %p565_p4 = pnand %p564_p3, %p558_p0 }
  0x81   :  { %v67_v19 = vpop.permute.xlu1 %66 }
  0x82   :  { %v33_v20 = vpop.permute.xlu0 %32 }
  0x83   :  { %v56_v21 = vmul.f32 %v44_v16, %v33_v20  ;;  %v57_v22 = vmul.f32 %v48_v17, %v33_v20  ;;  %v58_v23 = vmul.f32 %v52_v18, %v33_v20 }
  0x85   :  { %v74_v24 = vadd.f32 %v67_v19, %v56_v21  ;;  %v75_v25 = vadd.f32 %v67_v19, %v57_v22  ;;  %v76_v26 = vadd.f32 %v67_v19, %v58_v23  ;;  %v72_v31 = vpop.permute.xlu1 %71 }
  0x86   :  { %v38_v27 = vpop.permute.xlu0 %37 }
  0x87   :  { %v59_v28 = vmul.f32 %v44_v16, %v38_v27  ;;  %v60_v29 = vmul.f32 %v48_v17, %v38_v27  ;;  %v61_v30 = vmul.f32 %v52_v18, %v38_v27  ;;  %527 = vtanh.f32 %v74_v24 }
  0x88   :  { %529 = vtanh.f32 %v75_v25 }
  0x89   :  { %v77_v32 = vadd.f32 %v72_v31, %v59_v28  ;;  %v78_v33 = vadd.f32 %v72_v31, %v60_v29  ;;  %v79_v34 = vadd.f32 %v72_v31, %v61_v30  ;;  %531 = vtanh.f32 %v76_v26  ;;  %v98_v47 = vpop.permute.xlu1 %97 }
  0x8a   :  { %v93_v48 = vpop.permute.xlu0 %92 }
  0x8b   :  { %533 = vtanh.f32 %v77_v32 }
  0x8c   :  { %535 = vtanh.f32 %v78_v33 }
  0x8d   :  { %537 = vtanh.f32 %v79_v34 }
  0x8e   :  { %v280_v7 = vpop.permute.xlu0 %279 }
  0x91   :  { %v528_v35 = vpop.eup %527 }
  0x92   :  { %v530_v36 = vpop.eup %529 }
  0x93   :  { %v532_v37 = vpop.eup %531 }
  0x95   :  { %v534_v38 = vpop.eup %533 }
  0x96   :  { %v536_v39 = vpop.eup %535  ;;  %v500_v41 = vpack.c.bf16 %v534_v38, %v528_v35 }
  0x97   :  { %v538_v42 = vpop.eup %537  ;;  %v497_v43 = vpack.c.bf16 %v536_v39, %v530_v36 }
  0x98   :  { %v503_v44 = vpack.c.bf16 %v538_v42, %v532_v37 }
  0x99   :  { %499 = vmatprep.subr.msk.bf16.mxu0 %vm655_vm3, %v497_v43 }
  0x9a   :  { %505 = vmatprep.subr.msk.bf16.mxu1 %vm655_vm3, %v503_v44  ;;  %502 = vmatpush1.bf16.msk.msra.mxu0 %vm655_vm3, %v500_v41 }
  0x9b   :  { %508 = vmatpush3.bf16.msk.msra.mxu1 %vm655_vm3, %v503_v44  ;;  %515 = vmatprep.subr.bf16.mxu0 %v584_v46 }
  0x9d   :  { %466 = vmatmul.mubr.msk.f32.vlgmr.msra.gmra.mrb[0].mxu0 %vm100_vm0, %v86_v8 }
  0x9e   :  { %488 = vmatmul.mubr.msk.f32.vlgmr.msra.gmra.mrb[0].mxu1 %vm100_vm0, %v87_v45  ;;  %187 = vmatprep.mubr.f32.mxu0 %v582_v9 }
  0x9f   :  { %358 = vmatprep.mubr.f32.mxu1 %v582_v9 }
  0xa1   :  { %467 = vmatmul.mubr.msk.f32.gmra.mrb[2].mxu0 %vm100_vm0, %v87_v45 }
  0xa2   :  { %494 = vmatprep.mubr.msk.f32.mxu0 %vm585_vm4, %v582_v9 }
 0x170   :  { %v183_v49 = vpop.f32.mrb[0].mxu0 }
 0x171   :  { %v184_v50 = vadd.f32 %v183_v49, %v93_v48  ;;  %v489_v51 = vpop.f32.mrb[0].mxu1  ;;  %v185_v52 = vpop.f32.mrb[1].mxu0 }
 0x172   :  { %v266_v53 = vadd.f32 %v489_v51, %v98_v47  ;;  %v186_v54 = vadd.f32 %v185_v52, %v93_v48  ;;  %v260_v55 = vpop.f32.mrb[1].mxu1 }
 0x173   :  { %539 = vtanh.f32 %v184_v50  ;;  %v261_v56 = vadd.f32 %v260_v55, %v93_v48 }
 0x174   :  { %541 = vtanh.f32 %v266_v53  ;;  %v189_v57 = vpop.f32.mrb[2].mxu0 }
 0x175   :  { %543 = vtanh.f32 %v186_v54  ;;  %v190_v58 = vadd.f32 %v189_v57, %v98_v47  ;;  %v191_v59 = vpop.f32.mrb[3].mxu0 }
 0x176   :  { %545 = vtanh.f32 %v261_v56  ;;  %v192_v60 = vadd.f32 %v191_v59, %v98_v47 }
 0x177   :  { %547 = vtanh.f32 %v190_v58 }
 0x178   :  { %549 = vtanh.f32 %v192_v60 }
 0x17d   :  { %v540_v61 = vpop.eup %539 }
 0x17e   :  { %v542_v62 = vpop.eup %541 }
 0x17f   :  { %v544_v63 = vpop.eup %543 }
 0x180   :  { %v546_v0 = vpop.eup %545 }
 0x181   :  { %v548_v1 = vpop.eup %547  ;;  %v516_v2 = vpack.c.bf16 %v542_v62, %v546_v0 }
 0x182   :  { %v550_v3 = vpop.eup %549  ;;  %v512_v4 = vpack.c.bf16 %v548_v1, %v540_v61 }
 0x183   :  { %518 = vmatpush3.bf16.msk.msra.mxu0 %vm655_vm3, %v516_v2  ;;  %v509_v6 = vpack.c.bf16 %v550_v3, %v544_v63 }
 0x185   :  { %511 = vmatprep.subr.msk.bf16.mxu1 %vm655_vm3, %v509_v6 }
 0x186   :  { %495 = vmatmul.mubr.msk.f32.vlgmr.msra.gmra.mrb[4].mxu0 %vm100_vm0, %v275_v5  ;;  %514 = vmatpush1.bf16.msk.msra.mxu1 %vm655_vm3, %v512_v4 }
 0x189   :  { %473 = vmatmul.mubr.msk.f32.vlgmr.msra.gmra.mrb[2].mxu1 %vm100_vm0, %v275_v5 }
 0x259   :  { %v431_v8 = vpop.f32.mrb[4].mxu0 }
 0x25a   :  { %v432_v9 = vadd.f32 %v431_v8, %v280_v7  ;;  %v496_v10 = vpop.f32.mrb[5].mxu0 }
 0x25c   :  { %v437_v11 = vmul.f32 0.5, %v432_v9  ;;  %v360_v12 = vpop.f32.mrb[2].mxu1 }
 0x25d   :  { %v361_v13 = vadd.f32 %v360_v12, %v280_v7  ;;  %v362_v14 = vpop.f32.mrb[3].mxu1 }
 0x25e   :  { %551 = vtanh.f32 %v437_v11  ;;  %v363_v15 = vadd.f32 %v362_v14, %v280_v7 }
 0x25f   :  { %v435_v16 = vmul.f32 0.5, %v361_v13 }
 0x260   :  { %v436_v17 = vmul.f32 0.5, %v363_v15 }
 0x261   :  { %553 = vtanh.f32 %v435_v16 }
 0x262   :  { %555 = vtanh.f32 %v436_v17 }
 0x268   :  { %v552_v18 = vpop.eup %551 }
 0x269   :  { %v443_v19 = vmul.f32 0.5, %v552_v18 }
 0x26b   :  { %v554_v20 = vpop.eup %553  ;;  %v446_v21 = vadd.f32 0.5, %v443_v19 }
 0x26c   :  { %v556_v22 = vpop.eup %555  ;;  %v441_v23 = vmul.f32 0.5, %v554_v20 }
 0x26d   :  { %449 = vst [vmem:[#allocation2 + $0x10] sm:$0xff] %v446_v21  ;;  %v442_v24 = vmul.f32 0.5, %v556_v22 }
 0x26e   :  { %v444_v25 = vadd.f32 0.5, %v441_v23 }
 0x26f   :  { %v445_v26 = vadd.f32 0.5, %v442_v24 }
 0x270   :  { %447 = vst [vmem:[#allocation2] sm:$0xff] %v444_v25 }
 0x271   :  { %448 = vst [vmem:[#allocation2 + $0x8] sm:$0xff] %v445_v26 }
 0x272   :  { %568 = shalt.err (!%p565_p4)
}
 0x273   :  { %s569_s21 = scalar_lea.hbm %s703_s7, 384 }
 0x274   :  { %p570_p5 = scmp.ne.s32.totalorder %s703_s7, %s569_s21  ;;  %p573_p6 = scmp.lt.u32.totalorder %s569_s21, %s703_s7 }
 0x276   :  { %p575_p7 = pnand %p573_p6, %p570_p5 }
 0x278   :  { %578 = shalt.err (!%p575_p7)
}
 0x279   :  { %459 = dma.vmem_to_hbm [thread:$0]  %s457_s17, 384, %s703_s7, [#allocation3]  }
 0x27a   :  { %579 = dma.done.wait [#allocation3], 384  }
 0x27b   :  { %580 = vsyncadd [#allocation3], 4294966912 }
 0x27c   :  { %463 = vsyncpa [#allocation3], 1 }

</bundles_post_ra>
